<compile_context>
chip_gen: v5e
topology: v5e:2x2
jax: 0.10.0
libtpu: 0.0.40
codegen_flags: <defaults>
</compile_context>

<pallas_src>
import jax
import jax.numpy as jnp
from jax.experimental import pallas as pl
from jax.experimental.pallas import tpu as pltpu


def _round_up(x, m):
    return (x + m - 1) // m * m


def _build_kernel(batch, num_depth, num_classes, tile_b):
    """Returns the Pallas kernel body, closed over the static problem sizes."""
    n, c, tb = num_depth, num_classes, tile_b

    def kernel(lab_ref, emb_ref, wt_ref, b_ref, preds_ref, rowloss_ref):
        i = pl.program_id(0)

        # Class-major matmul on the MXU (NT dimension numbers, no transpose):
        # (NC_pad, ND) x (TB, ND), contracted on ND -> (NC_pad, TB).
        logits_t = jax.lax.dot_general(
            wt_ref[...], emb_ref[...],
            dimension_numbers=(((1,), (1,)), ((), ())),
            preferred_element_type=jnp.float32) + b_ref[...]   # (NC_pad, TB) f32

        lab = lab_ref[...]                                     # (1, TB) int32
        c_iota = jax.lax.broadcasted_iota(jnp.int32, (c, tb), 0)
        onehot = c_iota == lab                                 # (C, TB) bool

        row_loss = jnp.zeros((1, tb), jnp.float32)
        for dep in range(n):                                   # static unroll, N small
            lg = logits_t[dep * c:(dep + 1) * c, :]            # (C, TB)
            m = jnp.max(lg, axis=0, keepdims=True)             # (1, TB)
            # argmax over classes, first index wins ties (== torch/jnp argmax)
            pred = jnp.min(jnp.where(lg == m, c_iota, c), axis=0, keepdims=True)
            preds_ref[pl.ds(dep, 1), :] = pred                 # lane-dense row store
            # stabilised log-sum-exp and target logit (one-hot select over C rows)
            lse = m + jnp.log(jnp.sum(jnp.exp(lg - m), axis=0, keepdims=True))
            tgt = jnp.sum(jnp.where(onehot, lg, 0.0), axis=0, keepdims=True)
            row_loss = row_loss + (lse - tgt)

        # Mask padded batch rows; write per-row partial loss (reduced in wrapper).
        gid = i * tb + jax.lax.broadcasted_iota(jnp.int32, (1, tb), 1)
        rowloss_ref[...] = jnp.where(gid < batch, row_loss, 0.0)

    return kernel


def multi_depth_classifier(emb, lab, weights, biases, *, block_b=8192):
    """emb: (B, N, D) f32/bf16; lab: (B,) int; weights: (N, C, D); biases: (N, C).

    Returns (preds (B, N) int32, loss scalar f32), matching the PyTorch module.
    """
    B, N, D = emb.shape
    C = weights.shape[1]
    ND, NC = N * D, N * C
    NC_pad = _round_up(NC, 128)       # lane-aligned logits (padding never read)

    # Batch tile: with multiple grid steps the lane-dense lab / preds / loss
    # blocks must tile in 128-lane multiples; a single block only needs the
    # sublane pad.  Default block_b is large to amortize per-step overhead.
    if B > block_b:
        tb = _round_up(block_b, 128)
    else:
        tb = max(8, _round_up(B, 8))
    B_pad = _round_up(B, tb)
    grid = (B_pad // tb,)

    # Keep the caller's dtype for emb (bf16 halves the dominant HBM read);
    # do NOT insert a wrapper-side cast of the big array.
    emb_flat = emb.reshape(B, ND)
    lab_row = lab.astype(jnp.int32).reshape(1, B)
    if B_pad != B:
        emb_flat = jnp.pad(emb_flat, ((0, B_pad - B), (0, 0)))
        lab_row = jnp.pad(lab_row, ((0, 0), (0, B_pad - B)))

    # Class-major block-diagonal weights: row n*C+c of w_t holds weights[n, c]
    # placed at columns [n*D, (n+1)*D), so
    #   (w_t @ emb_flat.T)[n*C+c, b] == einsum('bnd,ncd->bnc')[b, n, c].
    eye_n = jnp.eye(N, dtype=jnp.float32)
    w_t = jnp.einsum('nm,ncd->ncmd', eye_n,
                     weights.astype(jnp.float32)).reshape(NC, ND)
    bias_col = biases.astype(jnp.float32).reshape(NC, 1)
    if NC_pad != NC:
        w_t = jnp.pad(w_t, ((0, NC_pad - NC), (0, 0)))
        bias_col = jnp.pad(bias_col, ((0, NC_pad - NC), (0, 0)))
    w_t = w_t.astype(emb_flat.dtype)      # match MXU input dtype (f32 or bf16)

    kernel = _build_kernel(B, N, C, tb)
    itemsize = jnp.dtype(emb_flat.dtype).itemsize

    preds_t, rowloss = pl.pallas_call(
        kernel,
        grid=grid,
        in_specs=[
            pl.BlockSpec((1, tb), lambda i: (0, i)),          # labels  (lane-dense)
            pl.BlockSpec((tb, ND), lambda i: (i, 0)),         # emb     (batch-tiled)
            pl.BlockSpec((NC_pad, ND), lambda i: (0, 0)),     # weights (resident)
            pl.BlockSpec((NC_pad, 1), lambda i: (0, 0)),      # biases  (resident)
        ],
        out_specs=(
            pl.BlockSpec((N, tb), lambda i: (0, i)),          # preds        (lane-dense)
            pl.BlockSpec((1, tb), lambda i: (0, i)),          # per-row loss (lane-dense)
        ),
        out_shape=(
            jax.ShapeDtypeStruct((N, B_pad), jnp.int32),
            jax.ShapeDtypeStruct((1, B_pad), jnp.float32),
        ),
        compiler_params=pltpu.CompilerParams(
            # No cross-step state -> batch axis is truly independent; "parallel"
            # lets v7x shard grid steps across both TensorCores.
            dimension_semantics=("parallel",),
            vmem_limit_bytes=48 * 1024 * 1024,
        ),
        cost_estimate=pl.CostEstimate(
            flops=int(2 * B_pad * ND * NC_pad + 12 * B_pad * NC),
            transcendentals=int(B_pad * (NC + N)),
            bytes_accessed=int(itemsize * B_pad * ND
                               + 4 * (B_pad                     # labels
                                      + NC_pad * ND + NC_pad    # weights + bias
                                      + N * B_pad + B_pad)),    # preds + row loss
        ),
    )(lab_row, emb_flat, w_t, bias_col)

    preds = preds_t.T[:B]                                      # back to (B, N)
    loss = jnp.sum(rowloss) * (1.0 / float(B * N))             # tiny final reduce
    return preds, loss


def _reference(emb, lab, weights, biases):
    B, N, _ = emb.shape
    logits = jnp.einsum('bnd,ncd->bnc', emb, weights) + biases[None]
    preds = jnp.argmax(logits, axis=-1).astype(jnp.int32)
    C = weights.shape[1]
    flat = logits.reshape(B * N, C)
    lab_rep = jnp.repeat(lab.astype(jnp.int32), N)
    loss = jnp.mean(jax.nn.logsumexp(flat, axis=-1)
                    - jnp.take_along_axis(flat, lab_rep[:, None], axis=-1)[:, 0])
    return preds, loss, logits


if __name__ == "__main__":
    num_depth, num_classes, num_features = 4, 8, 32
    key = jax.random.PRNGKey(0)
    k_w, k1, k2, k3, k4, k5, k6 = jax.random.split(key, 7)

    bound = 1.0 / (num_features ** 0.5)
    weights = jax.random.uniform(
        k_w, (num_depth, num_classes, num_features),
        dtype=jnp.float32, minval=-bound, maxval=bound)
    biases = jnp.zeros((num_depth, num_classes), dtype=jnp.float32)

    cases = []
    # Case 1: tiny batch (single block, padded to 8 rows).
    B1 = 2
    emb1 = jax.random.normal(k1, (B1, num_depth, num_features), dtype=jnp.float32)
    lab1 = jax.random.randint(k2, (B1,), 0, num_classes, dtype=jnp.int32)
    cases.append((emb1, lab1, {}))
    # Case 2: multi-block parallel grid with padding in the last block.
    B2 = 600
    emb2 = jax.random.normal(k3, (B2, num_depth, num_features), dtype=jnp.float32)
    lab2 = jax.random.randint(k4, (B2,), 0, num_classes, dtype=jnp.int32)
    cases.append((emb2, lab2, {"block_b": 256}))
    # Case 3: default large-tile path (tb = 8192, 2 parallel grid steps, padding).
    B3 = 10000
    emb3 = jax.random.normal(k5, (B3, num_depth, num_features), dtype=jnp.float32)
    lab3 = jax.random.randint(k6, (B3,), 0, num_classes, dtype=jnp.int32)
    cases.append((emb3, lab3, {}))

    for emb_i, lab_i, kw in cases:
        preds, loss = multi_depth_classifier(emb_i, lab_i, weights, biases, **kw)
        jax.block_until_ready((preds, loss))
        p_ref, l_ref, logits_ref = _reference(emb_i, lab_i, weights, biases)
        assert preds.shape == p_ref.shape
        # Exact argmax match except where the reference top-2 logits are within
        # float noise of each other (different f32 summation order can flip
        # genuine near-ties; this does not indicate a kernel bug).
        top2 = jax.lax.top_k(logits_ref, 2)[0]
        near_tie = (top2[..., 0] - top2[..., 1]) < 1e-5
        assert bool(jnp.all((preds == p_ref) | near_tie)), (preds, p_ref)
        assert bool(jnp.allclose(loss, l_ref, rtol=1e-4, atol=1e-4)), (loss, l_ref)

    print("KERNEL_OK")
</pallas_src>

<mosaic_0001>
module attributes {stable_mosaic.version = 11 : i64} {
  func.func @kernel(%arg0: i32, %arg1: memref<1x8xi32, #tpu.memory_space<vmem>>, %arg2: memref<8x128xf32, #tpu.memory_space<vmem>>, %arg3: memref<128x128xf32, #tpu.memory_space<vmem>>, %arg4: memref<128x1xf32, #tpu.memory_space<vmem>>, %arg5: memref<4x8xi32, #tpu.memory_space<vmem>>, %arg6: memref<1x8xf32, #tpu.memory_space<vmem>>) attributes {dimension_semantics = [#tpu.dimension_semantics<parallel>], iteration_bounds = array<i64: 1>, scalar_prefetch = 0 : i64, scratch_operands = 0 : i64, tpu.core_type = #tpu.core_type<tc>, window_params = [{transform_indices = @transform_0, window_bounds = array<i64: 1, 8>}, {transform_indices = @transform_1, window_bounds = array<i64: 8, 128>}, {pipeline_mode = #tpu.pipeline_mode<synchronous>, transform_indices = @transform_2, window_bounds = array<i64: 128, 128>}, {pipeline_mode = #tpu.pipeline_mode<synchronous>, transform_indices = @transform_3, window_bounds = array<i64: 128, 1>}, {transform_indices = @transform_4, window_bounds = array<i64: 4, 8>}, {transform_indices = @transform_5, window_bounds = array<i64: 1, 8>}]} {
    %c0 = arith.constant 0 : index
    %c0_0 = arith.constant 0 : index
    %0 = vector.load %arg3[%c0, %c0_0] : memref<128x128xf32, #tpu.memory_space<vmem>>, vector<128x128xf32>
    %c0_1 = arith.constant 0 : index
    %c0_2 = arith.constant 0 : index
    %1 = vector.load %arg2[%c0_1, %c0_2] : memref<8x128xf32, #tpu.memory_space<vmem>>, vector<8x128xf32>
    %cst = arith.constant dense<0.000000e+00> : vector<128x8xf32>
    %2 = tpu.matmul %0, %1, %cst {dimension_numbers = #tpu.dot_dimension_numbers<[1], [1], [0], [0], [0, 0, 1, 0], [], []>} : vector<128x128xf32>, vector<8x128xf32>, vector<128x8xf32> -> vector<128x8xf32>
    %c0_3 = arith.constant 0 : index
    %c0_4 = arith.constant 0 : index
    %3 = vector.load %arg4[%c0_3, %c0_4] : memref<128x1xf32, #tpu.memory_space<vmem>>, vector<128x1xf32>
    %4 = vector.broadcast %3 : vector<128x1xf32> to vector<128x8xf32>
    %5 = arith.addf %2, %4 : vector<128x8xf32>
    %c0_5 = arith.constant 0 : index
    %c0_6 = arith.constant 0 : index
    %6 = vector.load %arg1[%c0_5, %c0_6] : memref<1x8xi32, #tpu.memory_space<vmem>>, vector<1x8xi32>
    %7 = tpu.iota {dimensions = array<i32: 0>} : vector<8x8xi32>
    %8 = vector.broadcast %6 : vector<1x8xi32> to vector<8x8xi32>
    %9 = arith.cmpi eq, %7, %8 : vector<8x8xi32>
    %cst_7 = arith.constant 0.000000e+00 : f32
    %10 = vector.broadcast %cst_7 : f32 to vector<1x8xf32>
    %11 = vector.extract_strided_slice %5 {offsets = [0, 0], sizes = [8, 8], strides = [1, 1]} : vector<128x8xf32> to vector<8x8xf32>
    %cst_8 = arith.constant dense<0xFF800000> : vector<8xf32>
    %12 = vector.multi_reduction <maximumf>, %11, %cst_8 [0] : vector<8x8xf32> to vector<8xf32>
    %13 = vector.shape_cast %12 : vector<8xf32> to vector<1x8xf32>
    %14 = vector.broadcast %13 : vector<1x8xf32> to vector<8x8xf32>
    %15 = arith.cmpf oeq, %11, %14 : vector<8x8xf32>
    %c8_i32 = arith.constant 8 : i32
    %16 = vector.broadcast %c8_i32 : i32 to vector<8x8xi32>
    %17 = arith.select %15, %7, %16 : vector<8x8xi1>, vector<8x8xi32>
    %cst_9 = arith.constant dense<2147483647> : vector<8xi32>
    %18 = vector.multi_reduction <minsi>, %17, %cst_9 [0] : vector<8x8xi32> to vector<8xi32>
    %19 = vector.shape_cast %18 : vector<8xi32> to vector<1x8xi32>
    %c0_10 = arith.constant 0 : index
    %c0_11 = arith.constant 0 : index
    %20 = vector.load %arg5[%c0_10, %c0_11] : memref<4x8xi32, #tpu.memory_space<vmem>>, vector<1x8xi32>
    tpu.vector_store %arg5[%c0_10, %c0_11], %19 {strides = array<i32>} : memref<4x8xi32, #tpu.memory_space<vmem>>, vector<1x8xi32>,
    %21 = vector.broadcast %13 : vector<1x8xf32> to vector<8x8xf32>
    %22 = arith.subf %11, %21 : vector<8x8xf32>
    %23 = math.exp %22 : vector<8x8xf32>
    %cst_12 = arith.constant dense<0.000000e+00> : vector<8xf32>
    %24 = vector.multi_reduction <add>, %23, %cst_12 [0] : vector<8x8xf32> to vector<8xf32>
    %25 = vector.shape_cast %24 : vector<8xf32> to vector<1x8xf32>
    %26 = math.log %25 : vector<1x8xf32>
    %27 = arith.addf %13, %26 : vector<1x8xf32>
    %cst_13 = arith.constant 0.000000e+00 : f32
    %28 = vector.broadcast %cst_13 : f32 to vector<8x8xf32>
    %29 = arith.select %9, %11, %28 : vector<8x8xi1>, vector<8x8xf32>
    %cst_14 = arith.constant dense<0.000000e+00> : vector<8xf32>
    %30 = vector.multi_reduction <add>, %29, %cst_14 [0] : vector<8x8xf32> to vector<8xf32>
    %31 = vector.shape_cast %30 : vector<8xf32> to vector<1x8xf32>
    %32 = arith.subf %27, %31 : vector<1x8xf32>
    %33 = arith.addf %10, %32 : vector<1x8xf32>
    %34 = vector.extract_strided_slice %5 {offsets = [8, 0], sizes = [8, 8], strides = [1, 1]} : vector<128x8xf32> to vector<8x8xf32>
    %cst_15 = arith.constant dense<0xFF800000> : vector<8xf32>
    %35 = vector.multi_reduction <maximumf>, %34, %cst_15 [0] : vector<8x8xf32> to vector<8xf32>
    %36 = vector.shape_cast %35 : vector<8xf32> to vector<1x8xf32>
    %37 = vector.broadcast %36 : vector<1x8xf32> to vector<8x8xf32>
    %38 = arith.cmpf oeq, %34, %37 : vector<8x8xf32>
    %c8_i32_16 = arith.constant 8 : i32
    %39 = vector.broadcast %c8_i32_16 : i32 to vector<8x8xi32>
    %40 = arith.select %38, %7, %39 : vector<8x8xi1>, vector<8x8xi32>
    %cst_17 = arith.constant dense<2147483647> : vector<8xi32>
    %41 = vector.multi_reduction <minsi>, %40, %cst_17 [0] : vector<8x8xi32> to vector<8xi32>
    %42 = vector.shape_cast %41 : vector<8xi32> to vector<1x8xi32>
    %c1 = arith.constant 1 : index
    %c0_18 = arith.constant 0 : index
    %43 = vector.load %arg5[%c1, %c0_18] : memref<4x8xi32, #tpu.memory_space<vmem>>, vector<1x8xi32>
    tpu.vector_store %arg5[%c1, %c0_18], %42 {strides = array<i32>} : memref<4x8xi32, #tpu.memory_space<vmem>>, vector<1x8xi32>,
    %44 = vector.broadcast %36 : vector<1x8xf32> to vector<8x8xf32>
    %45 = arith.subf %34, %44 : vector<8x8xf32>
    %46 = math.exp %45 : vector<8x8xf32>
    %cst_19 = arith.constant dense<0.000000e+00> : vector<8xf32>
    %47 = vector.multi_reduction <add>, %46, %cst_19 [0] : vector<8x8xf32> to vector<8xf32>
    %48 = vector.shape_cast %47 : vector<8xf32> to vector<1x8xf32>
    %49 = math.log %48 : vector<1x8xf32>
    %50 = arith.addf %36, %49 : vector<1x8xf32>
    %cst_20 = arith.constant 0.000000e+00 : f32
    %51 = vector.broadcast %cst_20 : f32 to vector<8x8xf32>
    %52 = arith.select %9, %34, %51 : vector<8x8xi1>, vector<8x8xf32>
    %cst_21 = arith.constant dense<0.000000e+00> : vector<8xf32>
    %53 = vector.multi_reduction <add>, %52, %cst_21 [0] : vector<8x8xf32> to vector<8xf32>
    %54 = vector.shape_cast %53 : vector<8xf32> to vector<1x8xf32>
    %55 = arith.subf %50, %54 : vector<1x8xf32>
    %56 = arith.addf %33, %55 : vector<1x8xf32>
    %57 = vector.extract_strided_slice %5 {offsets = [16, 0], sizes = [8, 8], strides = [1, 1]} : vector<128x8xf32> to vector<8x8xf32>
    %cst_22 = arith.constant dense<0xFF800000> : vector<8xf32>
    %58 = vector.multi_reduction <maximumf>, %57, %cst_22 [0] : vector<8x8xf32> to vector<8xf32>
    %59 = vector.shape_cast %58 : vector<8xf32> to vector<1x8xf32>
    %60 = vector.broadcast %59 : vector<1x8xf32> to vector<8x8xf32>
    %61 = arith.cmpf oeq, %57, %60 : vector<8x8xf32>
    %c8_i32_23 = arith.constant 8 : i32
    %62 = vector.broadcast %c8_i32_23 : i32 to vector<8x8xi32>
    %63 = arith.select %61, %7, %62 : vector<8x8xi1>, vector<8x8xi32>
    %cst_24 = arith.constant dense<2147483647> : vector<8xi32>
    %64 = vector.multi_reduction <minsi>, %63, %cst_24 [0] : vector<8x8xi32> to vector<8xi32>
    %65 = vector.shape_cast %64 : vector<8xi32> to vector<1x8xi32>
    %c2 = arith.constant 2 : index
    %c0_25 = arith.constant 0 : index
    %66 = vector.load %arg5[%c2, %c0_25] : memref<4x8xi32, #tpu.memory_space<vmem>>, vector<1x8xi32>
    tpu.vector_store %arg5[%c2, %c0_25], %65 {strides = array<i32>} : memref<4x8xi32, #tpu.memory_space<vmem>>, vector<1x8xi32>,
    %67 = vector.broadcast %59 : vector<1x8xf32> to vector<8x8xf32>
    %68 = arith.subf %57, %67 : vector<8x8xf32>
    %69 = math.exp %68 : vector<8x8xf32>
    %cst_26 = arith.constant dense<0.000000e+00> : vector<8xf32>
    %70 = vector.multi_reduction <add>, %69, %cst_26 [0] : vector<8x8xf32> to vector<8xf32>
    %71 = vector.shape_cast %70 : vector<8xf32> to vector<1x8xf32>
    %72 = math.log %71 : vector<1x8xf32>
    %73 = arith.addf %59, %72 : vector<1x8xf32>
    %cst_27 = arith.constant 0.000000e+00 : f32
    %74 = vector.broadcast %cst_27 : f32 to vector<8x8xf32>
    %75 = arith.select %9, %57, %74 : vector<8x8xi1>, vector<8x8xf32>
    %cst_28 = arith.constant dense<0.000000e+00> : vector<8xf32>
    %76 = vector.multi_reduction <add>, %75, %cst_28 [0] : vector<8x8xf32> to vector<8xf32>
    %77 = vector.shape_cast %76 : vector<8xf32> to vector<1x8xf32>
    %78 = arith.subf %73, %77 : vector<1x8xf32>
    %79 = arith.addf %56, %78 : vector<1x8xf32>
    %80 = vector.extract_strided_slice %5 {offsets = [24, 0], sizes = [8, 8], strides = [1, 1]} : vector<128x8xf32> to vector<8x8xf32>
    %cst_29 = arith.constant dense<0xFF800000> : vector<8xf32>
    %81 = vector.multi_reduction <maximumf>, %80, %cst_29 [0] : vector<8x8xf32> to vector<8xf32>
    %82 = vector.shape_cast %81 : vector<8xf32> to vector<1x8xf32>
    %83 = vector.broadcast %82 : vector<1x8xf32> to vector<8x8xf32>
    %84 = arith.cmpf oeq, %80, %83 : vector<8x8xf32>
    %c8_i32_30 = arith.constant 8 : i32
    %85 = vector.broadcast %c8_i32_30 : i32 to vector<8x8xi32>
    %86 = arith.select %84, %7, %85 : vector<8x8xi1>, vector<8x8xi32>
    %cst_31 = arith.constant dense<2147483647> : vector<8xi32>
    %87 = vector.multi_reduction <minsi>, %86, %cst_31 [0] : vector<8x8xi32> to vector<8xi32>
    %88 = vector.shape_cast %87 : vector<8xi32> to vector<1x8xi32>
    %c3 = arith.constant 3 : index
    %c0_32 = arith.constant 0 : index
    %89 = vector.load %arg5[%c3, %c0_32] : memref<4x8xi32, #tpu.memory_space<vmem>>, vector<1x8xi32>
    tpu.vector_store %arg5[%c3, %c0_32], %88 {strides = array<i32>} : memref<4x8xi32, #tpu.memory_space<vmem>>, vector<1x8xi32>,
    %90 = vector.broadcast %82 : vector<1x8xf32> to vector<8x8xf32>
    %91 = arith.subf %80, %90 : vector<8x8xf32>
    %92 = math.exp %91 : vector<8x8xf32>
    %cst_33 = arith.constant dense<0.000000e+00> : vector<8xf32>
    %93 = vector.multi_reduction <add>, %92, %cst_33 [0] : vector<8x8xf32> to vector<8xf32>
    %94 = vector.shape_cast %93 : vector<8xf32> to vector<1x8xf32>
    %95 = math.log %94 : vector<1x8xf32>
    %96 = arith.addf %82, %95 : vector<1x8xf32>
    %cst_34 = arith.constant 0.000000e+00 : f32
    %97 = vector.broadcast %cst_34 : f32 to vector<8x8xf32>
    %98 = arith.select %9, %80, %97 : vector<8x8xi1>, vector<8x8xf32>
    %cst_35 = arith.constant dense<0.000000e+00> : vector<8xf32>
    %99 = vector.multi_reduction <add>, %98, %cst_35 [0] : vector<8x8xf32> to vector<8xf32>
    %100 = vector.shape_cast %99 : vector<8xf32> to vector<1x8xf32>
    %101 = arith.subf %96, %100 : vector<1x8xf32>
    %102 = arith.addf %79, %101 : vector<1x8xf32>
    %c8_i32_36 = arith.constant 8 : i32
    %103 = arith.muli %arg0, %c8_i32_36 : i32
    %104 = tpu.iota {dimensions = array<i32: 1>} : vector<1x8xi32>
    %105 = vector.broadcast %103 : i32 to vector<1x8xi32>
    %106 = arith.addi %105, %104 : vector<1x8xi32>
    %c2_i32 = arith.constant 2 : i32
    %107 = vector.broadcast %c2_i32 : i32 to vector<1x8xi32>
    %108 = arith.cmpi slt, %106, %107 : vector<1x8xi32>
    %cst_37 = arith.constant 0.000000e+00 : f32
    %109 = vector.broadcast %cst_37 : f32 to vector<1x8xf32>
    %110 = arith.select %108, %102, %109 : vector<1x8xi1>, vector<1x8xf32>
    %c0_38 = arith.constant 0 : index
    %c0_39 = arith.constant 0 : index
    %111 = vector.load %arg6[%c0_38, %c0_39] : memref<1x8xf32, #tpu.memory_space<vmem>>, vector<1x8xf32>
    tpu.vector_store %arg6[%c0_38, %c0_39], %110 {strides = array<i32>} : memref<1x8xf32, #tpu.memory_space<vmem>>, vector<1x8xf32>,
    return
  }
  func.func @transform_0(%arg0: i32) -> (i32, i32) {
    %c0_i32 = arith.constant 0 : i32
    %c0_i32_0 = arith.constant 0 : i32
    return %c0_i32, %arg0 : i32, i32
  }
  func.func @transform_1(%arg0: i32) -> (i32, i32) {
    %c0_i32 = arith.constant 0 : i32
    %c0_i32_0 = arith.constant 0 : i32
    return %arg0, %c0_i32 : i32, i32
  }
  func.func @transform_2(%arg0: i32) -> (i32, i32) {
    %c0_i32 = arith.constant 0 : i32
    %c0_i32_0 = arith.constant 0 : i32
    %c0_i32_1 = arith.constant 0 : i32
    return %c0_i32, %c0_i32_0 : i32, i32
  }
  func.func @transform_3(%arg0: i32) -> (i32, i32) {
    %c0_i32 = arith.constant 0 : i32
    %c0_i32_0 = arith.constant 0 : i32
    %c0_i32_1 = arith.constant 0 : i32
    return %c0_i32, %c0_i32_0 : i32, i32
  }
  func.func @transform_4(%arg0: i32) -> (i32, i32) {
    %c0_i32 = arith.constant 0 : i32
    %c0_i32_0 = arith.constant 0 : i32
    return %c0_i32, %arg0 : i32, i32
  }
  func.func @transform_5(%arg0: i32) -> (i32, i32) {
    %c0_i32 = arith.constant 0 : i32
    %c0_i32_0 = arith.constant 0 : i32
    return %c0_i32, %arg0 : i32, i32
  }
}

</mosaic_0001>

<bundles_post_ra>
// kernel: tpu_custom_call.1
= control target key start
LH: loop header
LB: loop body
LE: loop exit
PB: predicated region body
PF: predicated region fallthrough
CT: control target
= control target key end

     0   :  { %11 = vsyncpa [#allocation3], 0  ;;  %s701_s0 = inlined_call_operand.vmem [shape: s32[1,8], index: 0, kind: input, shape index: {}]   ;;  %s702_s1 = inlined_call_operand.hbm [shape: f32[8,128], index: 1, kind: input, shape index: {}]   ;;  %s703_s2 = inlined_call_operand.vmem [shape: f32[128,128], index: 2, kind: input, shape index: {}]   ;;  %s704_s3 = inlined_call_operand.vmem [shape: f32[128,1], index: 3, kind: input, shape index: {}]   ;;  %s705_s4 = inlined_call_operand.hbm [shape: s32[4,8], index: 4, kind: output, shape index: {0}]   ;;  %s706_s5 = inlined_call_operand.hbm [shape: f32[1,8], index: 5, kind: output, shape index: {1}]  }
   0x1   :  { %12 = vsyncpa [#allocation4], 0 }
   0x2   :  { %13 = vsyncpa [#allocation7], 0  ;;  %s21_s20 = sshll.u32 %s702_s1, 4  ;;  %s513_s21 = smov [#allocation2]   ;;  %s22_s20 = int_to_ptr.hbm [resolvable:$true] %s21_s20 }
   0x3   :  { %s23_s22 = sshll.u32 %s513_s21, 4  ;;  %s24_s22 = int_to_ptr.vmem [resolvable:$true] %s23_s22 }
   0x4   :  { %26 = dma.hbm_to_vmem [thread:$0]  %s22_s20, 128, %s24_s22, [#allocation3]  }
   0x5   :  { %507 = dma.done.wait [#allocation3], 128  }
   0x6   :  { %508 = vsyncadd [#allocation3], 4294967168  ;;  %v514_v0 = vmov 0   ;;  %v51_v1 = vld [vmem:[#allocation2] sm:$0xff]  ;;  %v54_v4 = vld [vmem:[%s704_s3 + $0x10] sm:$0xff]  ;;  %vm194_vm0 = vcmask 64512   ;;  %v190_v37 = vlaneseq }
   0x7   :  { %416 = vset.pattern.permute.xlu0 %v514_v0  ;;  %417 = vset.pattern.permute.xlu1 %v514_v0  ;;  %v35_v2 = vld [vmem:[%s703_s2] sm:$0xff]  ;;  %v53_v8 = vld [vmem:[%s704_s3 + $0x8] sm:$0xff]  ;;  %v55_v9 = vld [vmem:[%s704_s3 + $0x18] sm:$0xff]  ;;  %vm214_vm6 = vcmask 57344   ;;  %s383_s14 = sshll.u32 %s705_s4, 4  ;;  %s516_s4 = smov [#allocation6]   ;;  %s384_s14 = int_to_ptr.hbm [resolvable:$true] %s383_s14 }
   0x8   :  { %151 = vmatpush.xpose.msra.mxu0 %v51_v1  ;;  %v52_v3 = vld [vmem:[%s704_s3] sm:$0xff]  ;;  %410 = vmatpush.xpose.msra.mxu2 %v51_v1  ;;  %v36_v10 = vld [vmem:[%s703_s2 + $0x8] sm:$0xff]  ;;  %v37_v14 = vld [vmem:[%s703_s2 + $0x10] sm:$0xff]  ;;  %v621_v45 = vshrl.u32 %v190_v37, 7  ;;  %s392_s15 = sshll.u32 %s516_s4, 4  ;;  %s394_s18 = sshll.u32 %s706_s5, 4  ;;  %s393_s15 = int_to_ptr.vmem [resolvable:$true] %s392_s15  ;;  %s395_s18 = int_to_ptr.hbm [resolvable:$true] %s394_s18 }
   0x9   :  { %70 = vperm.xlu0 %416, %v52_v3   ;;  %80 = vperm.xlu1 %417, %v54_v4   ;;  %v43_v5 = vld [vmem:[%s703_s2 + $0x40] sm:$0xff]  ;;  %v44_v11 = vld [vmem:[%s703_s2 + $0x48] sm:$0xff]  ;;  %v45_v15 = vld [vmem:[%s703_s2 + $0x50] sm:$0xff] }
   0xa   :  { %411 = vmatpush.xpose.msra.mxu3 %v51_v1  ;;  %v47_v6 = vld [vmem:[%s703_s2 + $0x60] sm:$0xff]  ;;  %409 = vmatpush.xpose.msra.mxu1 %v51_v1  ;;  %v48_v12 = vld [vmem:[%s703_s2 + $0x68] sm:$0xff]  ;;  %v49_v16 = vld [vmem:[%s703_s2 + $0x70] sm:$0xff] }
   0xb   :  { %v39_v7 = vld [vmem:[%s703_s2 + $0x20] sm:$0xff]  ;;  %152 = vmatmul.f32.vlgmr.msra.gmra.mxu0 %v35_v2  ;;  %172 = vmatmul.f32.vlgmr.msra.gmra.mxu2 %v43_v5  ;;  %v40_v13 = vld [vmem:[%s703_s2 + $0x28] sm:$0xff]  ;;  %v41_v17 = vld [vmem:[%s703_s2 + $0x30] sm:$0xff] }
   0xc   :  { %v38_v18 = vld [vmem:[%s703_s2 + $0x18] sm:$0xff] }
   0xd   :  { %180 = vmatmul.f32.vlgmr.msra.gmra.mxu3 %v47_v6  ;;  %164 = vmatmul.f32.vlgmr.msra.gmra.mxu1 %v39_v7  ;;  %v46_v19 = vld [vmem:[%s703_s2 + $0x58] sm:$0xff] }
   0xe   :  { %v50_v20 = vld [vmem:[%s703_s2 + $0x78] sm:$0xff] }
   0xf   :  { %v42_v21 = vld [vmem:[%s703_s2 + $0x38] sm:$0xff] }
  0x11   :  { %75 = vperm.xlu0 %416, %v53_v8   ;;  %85 = vperm.xlu1 %417, %v55_v9  }
  0x13   :  { %155 = vmatmul.f32.gmra.mxu0 %v36_v10  ;;  %174 = vmatmul.f32.gmra.mxu2 %v44_v11 }
  0x15   :  { %182 = vmatmul.f32.gmra.mxu3 %v48_v12  ;;  %166 = vmatmul.f32.gmra.mxu1 %v40_v13 }
  0x1b   :  { %158 = vmatmul.f32.gmra.mxu0 %v37_v14  ;;  %176 = vmatmul.f32.gmra.mxu2 %v45_v15 }
  0x1d   :  { %184 = vmatmul.f32.gmra.mxu3 %v49_v16  ;;  %168 = vmatmul.f32.gmra.mxu1 %v41_v17 }
  0x23   :  { %161 = vmatmul.f32.gmra.mxu0 %v38_v18  ;;  %178 = vmatmul.f32.gmra.mxu2 %v46_v19 }
  0x25   :  { %186 = vmatmul.f32.gmra.mxu3 %v50_v20  ;;  %170 = vmatmul.f32.gmra.mxu1 %v42_v21 }
  0x7b   :  { %v71_v22 = vpop.permute.xlu0 %70  ;;  %v81_v41 = vpop.permute.xlu1 %80 }
  0x83   :  { %v76_v29 = vpop.permute.xlu0 %75  ;;  %v86_v1 = vpop.permute.xlu1 %85 }
  0x88   :  { %v153_v23 = vpop.f32.mrf.mxu0 }
  0x89   :  { %v610_v24 = vadd.f32 %v153_v23, %v71_v22 }
  0x8a   :  { %v165_v25 = vpop.f32.mrf.mxu1 }
  0x8b   :  { %v195_v26 = vsel %vm194_vm0, %v610_v24, -inf }
  0x8c   :  { %v196_v27 = vrot.slane %v195_v26, 4 }
  0x8e   :  { %v197_v28 = vmax.f32 %v195_v26, %v196_v27  ;;  %v173_v30 = vpop.f32.mrf.mxu2 }
  0x8f   :  { %v418_v30 = vld [vmem:[%s701_s0] ss:$0 sm:$0xff]  ;;  %s515_s0 = smov [#allocation5]  }
  0x90   :  { %v198_v31 = vrot.slane %v197_v28, 2  ;;  %v156_v32 = vpop.f32.mrf.mxu0  ;;  %v181_v33 = vpop.f32.mrf.mxu3  ;;  %vm193_vm10 = vcmp.eq.s32.totalorder %v621_v45, %v418_v30  ;;  %s381_s11 = sshll.u32 %s515_s0, 4  ;;  %s382_s11 = int_to_ptr.vmem [resolvable:$true] %s381_s11 }
  0x91   :  { %v614_v34 = vadd.f32 %v156_v32, %v76_v29 }
  0x92   :  { %v199_v35 = vmax.f32 %v197_v28, %v198_v31  ;;  %v167_v36 = vpop.f32.mrf.mxu1 }
  0x93   :  { %v239_v38 = vsel %vm194_vm0, %v614_v34, -inf }
  0x94   :  { %v200_v39 = vrot.slane %v199_v35, 1  ;;  %v240_v40 = vrot.slane %v239_v38, 4 }
  0x96   :  { %v618_v42 = vmax.f32 %v199_v35, %v200_v39  ;;  %v241_v43 = vmax.f32 %v239_v38, %v240_v40  ;;  %v175_v44 = vpop.f32.mrf.mxu2 }
  0x98   :  { %vm202_vm1 = vcmp.eq.f32.partialorder %v610_v24, %v618_v42  ;;  %v216_v46 = vsub.f32 %v610_v24, %v618_v42  ;;  %v242_v47 = vrot.slane %v241_v43, 2  ;;  %v159_v48 = vpop.f32.mrf.mxu0  ;;  %v183_v49 = vpop.f32.mrf.mxu3 }
  0x99   :  { %v203_v50 = vsel %vm202_vm1, %v621_v45, 8  ;;  %v628_v51 = vadd.f32 %v159_v48, %v81_v41 }
  0x9a   :  { %v204_v52 = vsel %vm194_vm0, %v203_v50, 2147483647  ;;  %v217_v53 = vmul.f32 1.442695, %v216_v46  ;;  %v243_v54 = vmax.f32 %v241_v43, %v242_v47  ;;  %v169_v55 = vpop.f32.mrf.mxu1 }
  0x9b   :  { %v205_v56 = vrot.slane %v204_v52, 4  ;;  %v282_v57 = vsel %vm194_vm0, %v628_v51, -inf  ;;  %v229_v55 = vsel %vm193_vm10, %v610_v24, 0.0 }
  0x9c   :  { %419 = vpow2.f32 %v217_v53  ;;  %v244_v58 = vrot.slane %v243_v54, 1  ;;  %v283_v59 = vrot.slane %v282_v57, 4 }
  0x9d   :  { %vm206_vm2 = vcmp.lt.s32.totalorder %v204_v52, %v205_v56 }
  0x9e   :  { %v207_v60 = vsel %vm206_vm2, %v204_v52, %v205_v56  ;;  %v633_v61 = vmax.f32 %v243_v54, %v244_v58  ;;  %v284_v62 = vmax.f32 %v282_v57, %v283_v59  ;;  %v177_v63 = vpop.f32.mrf.mxu2  ;;  %v272_v57 = vsel %vm193_vm10, %v614_v34, 0.0 }
  0x9f   :  { %v208_v0 = vrot.slane %v207_v60, 2 }
  0xa0   :  { %vm246_vm3 = vcmp.eq.f32.partialorder %v614_v34, %v633_v61  ;;  %v259_v2 = vsub.f32 %v614_v34, %v633_v61  ;;  %v285_v3 = vrot.slane %v284_v62, 2  ;;  %v162_v4 = vpop.f32.mrf.mxu0  ;;  %v185_v5 = vpop.f32.mrf.mxu3 }
  0xa1   :  { %vm209_vm4 = vcmp.lt.s32.totalorder %v207_v60, %v208_v0  ;;  %v247_v6 = vsel %vm246_vm3, %v621_v45, 8  ;;  %v640_v7 = vadd.f32 %v162_v4, %v86_v1  ;;  %v315_v4 = vsel %vm193_vm10, %v628_v51, 0.0 }
  0xa2   :  { %v420_v8 = vpop.eup %419  ;;  %v210_v9 = vsel %vm209_vm4, %v207_v60, %v208_v0  ;;  %v248_v10 = vsel %vm194_vm0, %v247_v6, 2147483647  ;;  %v260_v11 = vmul.f32 1.442695, %v259_v2  ;;  %v286_v12 = vmax.f32 %v284_v62, %v285_v3  ;;  %v171_v13 = vpop.f32.mrf.mxu1 }
  0xa3   :  { %v211_v14 = vrot.slane %v210_v9, 1  ;;  %v219_v15 = vsel %vm194_vm0, %v420_v8, 0.0  ;;  %v249_v16 = vrot.slane %v248_v10, 4  ;;  %v325_v18 = vsel %vm194_vm0, %v640_v7, -inf }
  0xa4   :  { %421 = vpow2.f32 %v260_v11  ;;  %v287_v17 = vrot.slane %v286_v12, 1  ;;  %v326_v19 = vrot.slane %v325_v18, 4  ;;  %v220_v20 = vrot.slane %v219_v15, 4 }
  0xa5   :  { %vm250_vm5 = vcmp.lt.s32.totalorder %v248_v10, %v249_v16  ;;  %vm212_vm7 = vcmp.lt.s32.totalorder %v210_v9, %v211_v14  ;;  %v273_v8 = vsel %vm194_vm0, %v272_v57, 0.0  ;;  %v316_v13 = vsel %vm194_vm0, %v315_v4, 0.0 }
  0xa6   :  { %v251_v21 = vsel %vm250_vm5, %v248_v10, %v249_v16  ;;  %v646_v22 = vmax.f32 %v286_v12, %v287_v17  ;;  %v179_v23 = vpop.f32.mrf.mxu2  ;;  %v327_v26 = vmax.f32 %v325_v18, %v326_v19  ;;  %v213_v29 = vsel %vm212_vm7, %v210_v9, %v211_v14 }
  0xa7   :  { %v252_v25 = vrot.slane %v251_v21, 2  ;;  %215 = vst.msk [vmem:[#allocation5] sm:$0x1] %vm214_vm6, %v213_v29  ;;  %v221_v35 = vadd.f32 %v220_v20, %v219_v15  ;;  %v230_v9 = vsel %vm194_vm0, %v229_v55, 0.0  ;;  %v274_v15 = vrot.slane %v273_v8, 4 }
  0xa8   :  { %vm289_vm8 = vcmp.eq.f32.partialorder %v628_v51, %v646_v22  ;;  %v302_v27 = vsub.f32 %v628_v51, %v646_v22  ;;  %v187_v28 = vpop.f32.mrf.mxu3  ;;  %v328_v32 = vrot.slane %v327_v26, 2  ;;  %v358_v17 = vsel %vm193_vm10, %v640_v7, 0.0 }
  0xa9   :  { %vm253_vm9 = vcmp.lt.s32.totalorder %v251_v21, %v252_v25  ;;  %v290_v31 = vsel %vm289_vm8, %v621_v45, 8  ;;  %v222_v48 = vrot.slane %v221_v35, 2  ;;  %v231_v18 = vrot.slane %v230_v9, 4 }
  0xaa   :  { %v422_v33 = vpop.eup %421  ;;  %v254_v36 = vsel %vm253_vm9, %v251_v21, %v252_v25  ;;  %v291_v38 = vsel %vm194_vm0, %v290_v31, 2147483647  ;;  %v303_v39 = vmul.f32 1.442695, %v302_v27  ;;  %v329_v44 = vmax.f32 %v327_v26, %v328_v32 }
  0xab   :  { %v255_v40 = vrot.slane %v254_v36, 1  ;;  %v262_v41 = vsel %vm194_vm0, %v422_v33, 0.0  ;;  %v292_v43 = vrot.slane %v291_v38, 4  ;;  %v223_v60 = vadd.f32 %v222_v48, %v221_v35 }
  0xac   :  { %v263_v46 = vrot.slane %v262_v41, 4  ;;  %423 = vpow2.f32 %v303_v39  ;;  %v330_v47 = vrot.slane %v329_v44, 1  ;;  %v317_v21 = vrot.slane %v316_v13, 4 }
  0xad   :  { %vm293_vm11 = vcmp.lt.s32.totalorder %v291_v38, %v292_v43  ;;  %vm256_vm12 = vcmp.lt.s32.totalorder %v254_v36, %v255_v40  ;;  %v224_v12 = vrot.slane %v223_v60, 1  ;;  %v359_v26 = vsel %vm194_vm0, %v358_v17, 0.0 }
  0xae   :  { %v264_v49 = vadd.f32 %v263_v46, %v262_v41  ;;  %v294_v50 = vsel %vm293_vm11, %v291_v38, %v292_v43  ;;  %v257_v52 = vsel %vm256_vm12, %v254_v36, %v255_v40  ;;  %v660_v54 = vmax.f32 %v329_v44, %v330_v47 }
  0xaf   :  { %v295_v53 = vrot.slane %v294_v50, 2  ;;  %258 = vst.msk [vmem:[#allocation5 + $0x1] sm:$0x1] %vm214_vm6, %v257_v52  ;;  %v225_v27 = vadd.f32 %v224_v12, %v223_v60  ;;  %v275_v28 = vadd.f32 %v274_v15, %v273_v8  ;;  %v232_v30 = vadd.f32 %v231_v18, %v230_v9 }
  0xb0   :  { %v265_v56 = vrot.slane %v264_v49, 2  ;;  %vm332_vm14 = vcmp.eq.f32.partialorder %v640_v7, %v660_v54  ;;  %v345_v58 = vsub.f32 %v640_v7, %v660_v54  ;;  %v318_v32 = vadd.f32 %v317_v21, %v316_v13 }
  0xb1   :  { %vm296_vm13 = vcmp.lt.s32.totalorder %v294_v50, %v295_v53  ;;  %v333_v0 = vsel %vm332_vm14, %v621_v45, 8  ;;  %v360_v33 = vrot.slane %v359_v26, 4  ;;  %v276_v39 = vrot.slane %v275_v28, 2 }
  0xb2   :  { %v424_v59 = vpop.eup %423  ;;  %v266_v62 = vadd.f32 %v265_v56, %v264_v49  ;;  %v297_v63 = vsel %vm296_vm13, %v294_v50, %v295_v53  ;;  %v334_v2 = vsel %vm194_vm0, %v333_v0, 2147483647  ;;  %v346_v3 = vmul.f32 1.442695, %v345_v58 }
  0xb3   :  { %v298_v1 = vrot.slane %v297_v63, 1  ;;  %v305_v24 = vsel %vm194_vm0, %v424_v59, 0.0  ;;  %v335_v5 = vrot.slane %v334_v2, 4  ;;  %v233_v41 = vrot.slane %v232_v30, 2 }
  0xb4   :  { %v306_v34 = vrot.slane %v305_v24, 4  ;;  %v267_v6 = vrot.slane %v266_v62, 1  ;;  %425 = vpow2.f32 %v346_v3  ;;  %v319_v43 = vrot.slane %v318_v32, 2 }
  0xb5   :  { %vm299_vm15 = vcmp.lt.s32.totalorder %v297_v63, %v298_v1  ;;  %vm336_vm1 = vcmp.lt.s32.totalorder %v334_v2, %v335_v5  ;;  %v361_v44 = vadd.f32 %v360_v33, %v359_v26  ;;  %v277_v48 = vadd.f32 %v276_v39, %v275_v28 }
  0xb6   :  { %v307_v10 = vadd.f32 %v306_v34, %v305_v24  ;;  %v300_v11 = vsel %vm299_vm15, %v297_v63, %v298_v1  ;;  %v337_v14 = vsel %vm336_vm1, %v334_v2, %v335_v5  ;;  %v268_v19 = vadd.f32 %v267_v6, %v266_v62 }
  0xb7   :  { %301 = vst.msk [vmem:[#allocation5 + $0x2] sm:$0x1] %vm214_vm6, %v300_v11  ;;  %v338_v51 = vrot.slane %v337_v14, 2  ;;  %v234_v53 = vadd.f32 %v233_v41, %v232_v30  ;;  %v320_v55 = vadd.f32 %v319_v43, %v318_v32  ;;  %v362_v56 = vrot.slane %v361_v44, 2 }
  0xb8   :  { %v308_v16 = vrot.slane %v307_v10, 2  ;;  %427 = vlog2.f32 %v268_v19  ;;  %v278_v59 = vrot.slane %v277_v48, 1  ;;  %v370_v13 = vand.u32 127, %v190_v37 }
  0xb9   :  { %vm339_vm2 = vcmp.lt.s32.totalorder %v337_v14, %v338_v51  ;;  %429 = vlog2.f32 %v225_v27  ;;  %v235_v63 = vrot.slane %v234_v53, 1  ;;  %v321_v0 = vrot.slane %v320_v55, 1 }
  0xba   :  { %v309_v20 = vadd.f32 %v308_v16, %v307_v10  ;;  %v426_v23 = vpop.eup %425  ;;  %v340_v25 = vsel %vm339_vm2, %v337_v14, %v338_v51  ;;  %v363_v1 = vadd.f32 %v362_v56, %v361_v44  ;;  %v279_v2 = vadd.f32 %v278_v59, %v277_v48 }
  0xbb   :  { %v341_v29 = vrot.slane %v340_v25, 1  ;;  %v348_v45 = vsel %vm194_vm0, %v426_v23, 0.0  ;;  %v236_v4 = vadd.f32 %v235_v63, %v234_v53  ;;  %v322_v6 = vadd.f32 %v321_v0, %v320_v55 }
  0xbc   :  { %v310_v7 = vrot.slane %v309_v20, 1  ;;  %v349_v31 = vrot.slane %v348_v45, 4  ;;  %v364_v8 = vrot.slane %v363_v1, 1  ;;  %vm373_vm0 = vcmp.lt.s32.totalorder %v370_v13, 2 }
  0xbd   :  { %vm342_vm3 = vcmp.lt.s32.totalorder %v340_v25, %v341_v29 }
  0xbe   :  { %v311_v35 = vadd.f32 %v310_v7, %v309_v20  ;;  %v350_v36 = vadd.f32 %v349_v31, %v348_v45  ;;  %v343_v38 = vsel %vm342_vm3, %v340_v25, %v341_v29  ;;  %v428_v46 = vpop.eup %427  ;;  %v365_v16 = vadd.f32 %v364_v8, %v363_v1 }
  0xbf   :  { %344 = vst.msk [vmem:[#allocation5 + $0x3] sm:$0x1] %vm214_vm6, %v343_v38  ;;  %v430_v49 = vpop.eup %429  ;;  %v270_v57 = vmul.f32 0.6931472, %v428_v46 }
  0xc0   :  { %431 = vlog2.f32 %v311_v35  ;;  %v351_v40 = vrot.slane %v350_v36, 2  ;;  %386 = dma.vmem_to_hbm [thread:$0]  %s382_s11, 64, %s384_s14, [#allocation4]   ;;  %v227_v60 = vmul.f32 0.6931472, %v430_v49 }
  0xc1   :  { %v271_v24 = vadd.f32 %v270_v57, %v633_v61 }
  0xc2   :  { %v352_v47 = vadd.f32 %v351_v40, %v350_v36  ;;  %v228_v3 = vadd.f32 %v227_v60, %v618_v42 }
  0xc3   :  { %v280_v5 = vsub.f32 %v271_v24, %v279_v2 }
  0xc4   :  { %v353_v50 = vrot.slane %v352_v47, 1  ;;  %v237_v10 = vsub.f32 %v228_v3, %v236_v4 }
  0xc6   :  { %v432_v52 = vpop.eup %431  ;;  %v354_v58 = vadd.f32 %v353_v50, %v352_v47  ;;  %v281_v14 = vadd.f32 %v280_v5, %v237_v10 }
  0xc7   :  { %v313_v62 = vmul.f32 0.6931472, %v432_v52 }
  0xc8   :  { %433 = vlog2.f32 %v354_v58 }
  0xc9   :  { %v314_v34 = vadd.f32 %v313_v62, %v646_v22 }
  0xcb   :  { %v323_v11 = vsub.f32 %v314_v34, %v322_v6 }
  0xcd   :  { %v324_v61 = vadd.f32 %v323_v11, %v281_v14 }
  0xce   :  { %v434_v9 = vpop.eup %433 }
  0xcf   :  { %v356_v12 = vmul.f32 0.6931472, %v434_v9 }
  0xd1   :  { %v357_v15 = vadd.f32 %v356_v12, %v660_v54 }
  0xd3   :  { %v366_v51 = vsub.f32 %v357_v15, %v365_v16 }
  0xd5   :  { %v367_v42 = vadd.f32 %v366_v51, %v324_v61 }
  0xd7   :  { %v374_v22 = vsel %vm373_vm0, %v367_v42, 0.0 }
  0xd8   :  { %375 = vst.msk [vmem:[#allocation6] sm:$0x1] %vm214_vm6, %v374_v22 }
  0xd9   :  { %397 = dma.vmem_to_hbm [thread:$0]  %s393_s15, 16, %s395_s18, [#allocation7]  }
  0xda   :  { %509 = dma.done.wait [#allocation4], 64  }
  0xdb   :  { %510 = vsyncadd [#allocation4], 4294967232 }
  0xdc   :  { %511 = dma.done.wait [#allocation7], 16  }
  0xdd   :  { %512 = vsyncadd [#allocation7], 4294967280 }
  0xde   :  { %406 = vsyncpa [#allocation3], 1 }
  0xdf   :  { %407 = vsyncpa [#allocation4], 1 }
  0xe0   :  { %408 = vsyncpa [#allocation7], 1 }

</bundles_post_ra>
